<compile_context>
chip_gen: v5e
topology: v5e:2x2
jax: 0.10.0
libtpu: 0.0.40
codegen_flags: <defaults>
</compile_context>

<pallas_src>
import functools

import jax
import jax.numpy as jnp
from jax.experimental import pallas as pl
from jax.experimental.pallas import tpu as pltpu


def _round_up(n, m):
    return ((n + m - 1) // m) * m


def _propagator_kernel(x_ref, w_ref, b_ref, o_ref):
    # x_ref: (TM, D_in)  w_ref: (D_in, D_out)  b_ref: (1, D_out)  o_ref: (TM, D_out)
    y = jnp.dot(x_ref[...], w_ref[...], preferred_element_type=jnp.float32)
    y = y + b_ref[...]
    o_ref[...] = jnp.maximum(y, 0.0).astype(o_ref.dtype)


def _propagator_res_kernel(x_ref, res_ref, w_ref, b_ref, o_ref):
    # Same as above plus the residual add before the ReLU.
    y = jnp.dot(x_ref[...], w_ref[...], preferred_element_type=jnp.float32)
    y = y + b_ref[...] + res_ref[...]
    o_ref[...] = jnp.maximum(y, 0.0).astype(o_ref.dtype)


@functools.partial(jax.jit, static_argnames=("residual", "tile_m"))
def propagator_forward(x, params, res=None, *, residual=False, tile_m=2048):
    """Pallas forward of Propagator.

    x:   [M, input_size] float32
    res: [M, output_size] float32 (only used when residual=True)
    """
    M, D_in = x.shape
    w, b = params["w"], params["b"]          # w: [D_in, D_out], b: [1, D_out]
    D_out = w.shape[1]

    # Row tile: multiple of 8 sublanes, capped so double-buffered x/res/out plus
    # the resident weights stay well under scoped VMEM on every TPU generation.
    tm = min(_round_up(tile_m, 8), _round_up(M, 8))
    M_pad = _round_up(M, tm)
    if M_pad != M:
        x = jnp.pad(x, ((0, M_pad - M), (0, 0)))
        if residual:
            res = jnp.pad(res, ((0, M_pad - M), (0, 0)))
    grid = (M_pad // tm,)

    x_spec = pl.BlockSpec((tm, D_in), lambda i: (i, 0))
    w_spec = pl.BlockSpec((D_in, D_out), lambda i: (0, 0))   # resident across tiles
    b_spec = pl.BlockSpec((1, D_out), lambda i: (0, 0))      # resident across tiles
    out_spec = pl.BlockSpec((tm, D_out), lambda i: (0, 0) if False else (i, 0))

    if residual:
        res_spec = pl.BlockSpec((tm, D_out), lambda i: (i, 0))
        kernel = _propagator_res_kernel
        in_specs = [x_spec, res_spec, w_spec, b_spec]
        args = (x, res, w, b)
    else:
        kernel = _propagator_kernel
        in_specs = [x_spec, w_spec, b_spec]
        args = (x, w, b)

    out = pl.pallas_call(
        kernel,
        out_shape=jax.ShapeDtypeStruct((M_pad, D_out), x.dtype),
        grid_spec=pl.GridSpec(
            grid=grid,
            in_specs=in_specs,
            out_specs=out_spec,
        ),
        compiler_params=pltpu.CompilerParams(
            dimension_semantics=("parallel",),
        ),
    )(*args)

    return out[:M]


def init_params(key, input_size, output_size):
    """Mirrors nn.Linear(input_size, output_size) init; weight stored transposed
    as [in, out] so the kernel computes x @ W directly."""
    kw, kb = jax.random.split(key)
    bound = 1.0 / jnp.sqrt(input_size)
    w = jax.random.uniform(kw, (input_size, output_size), jnp.float32, -bound, bound)
    b = jax.random.uniform(kb, (1, output_size), jnp.float32, -bound, bound)
    return {"w": w, "b": b}


def reference_forward(x, params, res=None, residual=False):
    y = x @ params["w"] + params["b"][0]
    if residual:
        y = y + res
    return jax.nn.relu(y)


if __name__ == "__main__":
    key = jax.random.PRNGKey(0)
    k_x, k_r, k_p = jax.random.split(key, 3)

    # Small shapes consistent with the module: x is [n_particles, input_size].
    n_particles = 100          # deliberately not a multiple of 8 -> exercises padding
    input_size = 16
    output_size = 32

    x = jax.random.normal(k_x, (n_particles, input_size), jnp.float32)
    res = jax.random.normal(k_r, (n_particles, output_size), jnp.float32)
    params = init_params(k_p, input_size, output_size)

    # residual = False path (default construction of Propagator)
    out = propagator_forward(x, params, residual=False)
    out = jax.block_until_ready(out)
    ref = reference_forward(x, params)
    assert out.shape == (n_particles, output_size)
    assert jnp.allclose(out, ref, atol=1e-5, rtol=1e-5), "mismatch (residual=False)"

    # residual = True path
    out_r = propagator_forward(x, params, res=res, residual=True)
    out_r = jax.block_until_ready(out_r)
    ref_r = reference_forward(x, params, res=res, residual=True)
    assert out_r.shape == (n_particles, output_size)
    assert jnp.allclose(out_r, ref_r, atol=1e-5, rtol=1e-5), "mismatch (residual=True)"

    print("KERNEL_OK")
</pallas_src>

<mosaic_0001>
module attributes {stable_mosaic.version = 11 : i64} {
  func.func @_propagator_kernel(%arg0: i32, %arg1: memref<104x16xf32, #tpu.memory_space<vmem>>, %arg2: memref<16x32xf32, #tpu.memory_space<vmem>>, %arg3: memref<1x32xf32, #tpu.memory_space<vmem>>, %arg4: memref<104x32xf32, #tpu.memory_space<vmem>>) attributes {dimension_semantics = [#tpu.dimension_semantics<parallel>], iteration_bounds = array<i64: 1>, scalar_prefetch = 0 : i64, scratch_operands = 0 : i64, tpu.core_type = #tpu.core_type<tc>, window_params = [{transform_indices = @transform_0, window_bounds = array<i64: 104, 16>}, {pipeline_mode = #tpu.pipeline_mode<synchronous>, transform_indices = @transform_1, window_bounds = array<i64: 16, 32>}, {pipeline_mode = #tpu.pipeline_mode<synchronous>, transform_indices = @transform_2, window_bounds = array<i64: 1, 32>}, {transform_indices = @transform_3, window_bounds = array<i64: 104, 32>}]} {
    %c0 = arith.constant 0 : index
    %c0_0 = arith.constant 0 : index
    %0 = vector.load %arg1[%c0, %c0_0] : memref<104x16xf32, #tpu.memory_space<vmem>>, vector<104x16xf32>
    %c0_1 = arith.constant 0 : index
    %c0_2 = arith.constant 0 : index
    %1 = vector.load %arg2[%c0_1, %c0_2] : memref<16x32xf32, #tpu.memory_space<vmem>>, vector<16x32xf32>
    %cst = arith.constant dense<0.000000e+00> : vector<104x32xf32>
    %2 = tpu.matmul %0, %1, %cst {dimension_numbers = #tpu.dot_dimension_numbers<[1], [0], [0], [1], [0, 0, 1, 1], [], []>} : vector<104x16xf32>, vector<16x32xf32>, vector<104x32xf32> -> vector<104x32xf32>
    %c0_3 = arith.constant 0 : index
    %c0_4 = arith.constant 0 : index
    %3 = vector.load %arg3[%c0_3, %c0_4] : memref<1x32xf32, #tpu.memory_space<vmem>>, vector<1x32xf32>
    %4 = vector.broadcast %3 : vector<1x32xf32> to vector<104x32xf32>
    %5 = arith.addf %2, %4 : vector<104x32xf32>
    %cst_5 = arith.constant 0.000000e+00 : f32
    %6 = vector.broadcast %cst_5 : f32 to vector<104x32xf32>
    %7 = arith.maximumf %5, %6 : vector<104x32xf32>
    %c0_6 = arith.constant 0 : index
    %c0_7 = arith.constant 0 : index
    %8 = vector.load %arg4[%c0_6, %c0_7] : memref<104x32xf32, #tpu.memory_space<vmem>>, vector<104x32xf32>
    tpu.vector_store %arg4[%c0_6, %c0_7], %7 {strides = array<i32>} : memref<104x32xf32, #tpu.memory_space<vmem>>, vector<104x32xf32>,
    return
  }
  func.func @transform_0(%arg0: i32) -> (i32, i32) {
    %c0_i32 = arith.constant 0 : i32
    %c0_i32_0 = arith.constant 0 : i32
    return %arg0, %c0_i32 : i32, i32
  }
  func.func @transform_1(%arg0: i32) -> (i32, i32) {
    %c0_i32 = arith.constant 0 : i32
    %c0_i32_0 = arith.constant 0 : i32
    %c0_i32_1 = arith.constant 0 : i32
    return %c0_i32, %c0_i32_0 : i32, i32
  }
  func.func @transform_2(%arg0: i32) -> (i32, i32) {
    %c0_i32 = arith.constant 0 : i32
    %c0_i32_0 = arith.constant 0 : i32
    %c0_i32_1 = arith.constant 0 : i32
    return %c0_i32, %c0_i32_0 : i32, i32
  }
  func.func @transform_3(%arg0: i32) -> (i32, i32) {
    %c0_i32 = arith.constant 0 : i32
    %c0_i32_0 = arith.constant 0 : i32
    return %arg0, %c0_i32 : i32, i32
  }
}

</mosaic_0001>

<bundles_post_ra>
// kernel: propagator_forward.1
= control target key start
LH: loop header
LB: loop body
LE: loop exit
PB: predicated region body
PF: predicated region fallthrough
CT: control target
= control target key end

     0   :  { %vm33_vm0 = vcmask 130048   ;;  %vm142_vm1 = vcmask 261120   ;;  %s313_s1 = inlined_call_operand.vmem [shape: f32[16,32], index: 1, kind: input, shape index: {}]   ;;  %s314_s0 = inlined_call_operand.vmem [shape: f32[104,16], index: 0, kind: input, shape index: {}]   ;;  %s315_s2 = inlined_call_operand.vmem [shape: f32[1,32], index: 2, kind: input, shape index: {}]   ;;  %s316_s3 = inlined_call_operand.vmem [shape: f32[104,32], index: 3, kind: output, shape index: {}]  }
   0x1   :  { %v28_v0 = vld [vmem:[%s313_s1 + $0x8] sm:$0xff]  ;;  %v27_v1 = vld [vmem:[%s313_s1] sm:$0xff]  ;;  %v21_v2 = vld [vmem:[%s314_s0 + $0x38] sm:$0xff] }
   0x2   :  { %174 = vmatpush.msra.mxu2 %v28_v0  ;;  %173 = vmatpush.msra.mxu1 %v28_v0  ;;  %v17_v3 = vld [vmem:[%s314_s0 + $0x18] sm:$0xff]  ;;  %v14_v4 = vld [vmem:[%s314_s0] sm:$0xff]  ;;  %v15_v8 = vld [vmem:[%s314_s0 + $0x8] sm:$0xff] }
   0x3   :  { %87 = vmatpush.msra.mxu0 %v28_v0  ;;  %175 = vmatpush.msra.mxu3 %v28_v0  ;;  %v25_v5 = vld [vmem:[%s314_s0 + $0x58] sm:$0xff]  ;;  %v22_v6 = vld [vmem:[%s314_s0 + $0x40] sm:$0xff]  ;;  %v23_v10 = vld [vmem:[%s314_s0 + $0x48] sm:$0xff] }
   0x4   :  { %177 = vmatpush.msra.mxu2 %v27_v1  ;;  %176 = vmatpush.msra.mxu1 %v27_v1  ;;  %v18_v7 = vld [vmem:[%s314_s0 + $0x20] sm:$0xff]  ;;  %v19_v11 = vld [vmem:[%s314_s0 + $0x28] sm:$0xff]  ;;  %v16_v12 = vld [vmem:[%s314_s0 + $0x10] sm:$0xff] }
   0x5   :  { %167 = vmatmul.msk.f32.vlgmr.msra.gmra.mxu2 %vm33_vm0, %v21_v2  ;;  %163 = vmatmul.msk.f32.vlgmr.msra.gmra.mxu1 %vm33_vm0, %v17_v3  ;;  %v26_v9 = vld [vmem:[%s314_s0 + $0x60] sm:$0xff]  ;;  %v24_v13 = vld [vmem:[%s314_s0 + $0x50] sm:$0xff] }
   0x6   :  { %88 = vmatpush.msra.mxu0 %v27_v1  ;;  %178 = vmatpush.msra.mxu3 %v27_v1  ;;  %v20_v14 = vld [vmem:[%s314_s0 + $0x30] sm:$0xff]  ;;  %v179_v15 = vld [vmem:[%s315_s2] ss:$0 sm:$0xff] }
   0x7   :  { %160 = vmatmul.msk.f32.vlgmr.msra.gmra.mxu0 %vm33_vm0, %v14_v4  ;;  %171 = vmatmul.msk.f32.vlgmr.msra.gmra.mxu3 %vm33_vm0, %v25_v5 }
   0xd   :  { %168 = vmatmul.msk.f32.gmra.mxu2 %vm33_vm0, %v22_v6  ;;  %164 = vmatmul.msk.f32.gmra.mxu1 %vm33_vm0, %v18_v7 }
   0xf   :  { %161 = vmatmul.msk.f32.gmra.mxu0 %vm33_vm0, %v15_v8  ;;  %172 = vmatmul.msk.f32.gmra.mxu3 %vm33_vm0, %v26_v9 }
  0x15   :  { %169 = vmatmul.msk.f32.gmra.mxu2 %vm33_vm0, %v23_v10  ;;  %165 = vmatmul.msk.f32.gmra.mxu1 %vm33_vm0, %v19_v11 }
  0x17   :  { %162 = vmatmul.msk.f32.gmra.mxu0 %vm33_vm0, %v16_v12 }
  0x1d   :  { %170 = vmatmul.msk.f32.gmra.mxu2 %vm33_vm0, %v24_v13  ;;  %166 = vmatmul.msk.f32.gmra.mxu1 %vm33_vm0, %v20_v14 }
  0x82   :  { %v99_v16 = vpop.f32.mrf.mxu1 }
  0x83   :  { %v100_v17 = vadd.f32 %v179_v15, %v99_v16 }
  0x84   :  { %v90_v18 = vpop.f32.mrf.mxu0 }
  0x85   :  { %v132_v19 = vmax.f32 %v100_v17, 0.0  ;;  %v91_v20 = vadd.f32 %v179_v15, %v90_v18 }
  0x87   :  { %146 = vst.msk [vmem:[%s316_s3 + $0x18] sm:$0xff] %vm142_vm1, %v132_v19  ;;  %v129_v21 = vmax.f32 %v91_v20, 0.0 }
  0x88   :  { %v111_v22 = vpop.f32.mrf.mxu2 }
  0x89   :  { %v112_v23 = vadd.f32 %v179_v15, %v111_v22  ;;  %143 = vst.msk [vmem:[%s316_s3] sm:$0xff] %vm142_vm1, %v129_v21 }
  0x8a   :  { %v102_v24 = vpop.f32.mrf.mxu1  ;;  %v123_v25 = vpop.f32.mrf.mxu3 }
  0x8b   :  { %v136_v26 = vmax.f32 %v112_v23, 0.0  ;;  %v103_v27 = vadd.f32 %v179_v15, %v102_v24  ;;  %v124_v28 = vadd.f32 %v179_v15, %v123_v25 }
  0x8c   :  { %v93_v29 = vpop.f32.mrf.mxu0 }
  0x8d   :  { %150 = vst.msk [vmem:[%s316_s3 + $0x38] sm:$0xff] %vm142_vm1, %v136_v26  ;;  %v133_v30 = vmax.f32 %v103_v27, 0.0  ;;  %v94_v31 = vadd.f32 %v179_v15, %v93_v29  ;;  %v140_v32 = vmax.f32 %v124_v28, 0.0 }
  0x8f   :  { %147 = vst.msk [vmem:[%s316_s3 + $0x20] sm:$0xff] %vm142_vm1, %v133_v30  ;;  %v130_v33 = vmax.f32 %v94_v31, 0.0 }
  0x90   :  { %v114_v34 = vpop.f32.mrf.mxu2  ;;  %154 = vst.msk [vmem:[%s316_s3 + $0x58] sm:$0xff] %vm142_vm1, %v140_v32 }
  0x91   :  { %v115_v35 = vadd.f32 %v179_v15, %v114_v34  ;;  %144 = vst.msk [vmem:[%s316_s3 + $0x8] sm:$0xff] %vm142_vm1, %v130_v33 }
  0x92   :  { %v105_v36 = vpop.f32.mrf.mxu1  ;;  %v126_v37 = vpop.f32.mrf.mxu3 }
  0x93   :  { %v137_v38 = vmax.f32 %v115_v35, 0.0  ;;  %v106_v39 = vadd.f32 %v179_v15, %v105_v36  ;;  %v127_v40 = vadd.f32 %v179_v15, %v126_v37 }
  0x94   :  { %v96_v41 = vpop.f32.mrf.mxu0 }
  0x95   :  { %151 = vst.msk [vmem:[%s316_s3 + $0x40] sm:$0xff] %vm142_vm1, %v137_v38  ;;  %v134_v42 = vmax.f32 %v106_v39, 0.0  ;;  %v97_v43 = vadd.f32 %v179_v15, %v96_v41  ;;  %v141_v44 = vmax.f32 %v127_v40, 0.0 }
  0x97   :  { %148 = vst.msk [vmem:[%s316_s3 + $0x28] sm:$0xff] %vm142_vm1, %v134_v42  ;;  %v131_v45 = vmax.f32 %v97_v43, 0.0 }
  0x98   :  { %v117_v46 = vpop.f32.mrf.mxu2  ;;  %155 = vst.msk [vmem:[%s316_s3 + $0x60] sm:$0xff] %vm142_vm1, %v141_v44 }
  0x99   :  { %v118_v47 = vadd.f32 %v179_v15, %v117_v46  ;;  %145 = vst.msk [vmem:[%s316_s3 + $0x10] sm:$0xff] %vm142_vm1, %v131_v45 }
  0x9a   :  { %v108_v48 = vpop.f32.mrf.mxu1 }
  0x9b   :  { %v138_v49 = vmax.f32 %v118_v47, 0.0  ;;  %v109_v50 = vadd.f32 %v179_v15, %v108_v48 }
  0x9d   :  { %152 = vst.msk [vmem:[%s316_s3 + $0x48] sm:$0xff] %vm142_vm1, %v138_v49  ;;  %v135_v51 = vmax.f32 %v109_v50, 0.0 }
  0x9f   :  { %149 = vst.msk [vmem:[%s316_s3 + $0x30] sm:$0xff] %vm142_vm1, %v135_v51 }
  0xa0   :  { %v120_v52 = vpop.f32.mrf.mxu2 }
  0xa1   :  { %v121_v53 = vadd.f32 %v179_v15, %v120_v52 }
  0xa3   :  { %v139_v54 = vmax.f32 %v121_v53, 0.0 }
  0xa5   :  { %153 = vst.msk [vmem:[%s316_s3 + $0x50] sm:$0xff] %vm142_vm1, %v139_v54 }

</bundles_post_ra>
